<compile_context>
chip_gen: v7x
topology: tpu7x:2x2x1
jax: 0.10.0
libtpu: 0.0.40
codegen_flags: <defaults>
</compile_context>

<pallas_src>
import functools

import jax
import jax.numpy as jnp
import numpy as np
from jax import lax
from jax.experimental import pallas as pl
from jax.experimental.pallas import tpu as pltpu


# ----------------------------------------------------------------------------
# Kernel 1: fused input projection for BOTH directions as one large matmul.
#   x_proj = x2d @ [W_ih_f^T | W_ih_b^T] + [b_ih_f+b_hh_f | b_ih_b+b_hh_b]
#   x2d: (T*B, E), w: (E, 8H), b: (1, 8H)  ->  (T*B, 8H) f32
# ----------------------------------------------------------------------------
def _input_proj_kernel(x_ref, w_ref, b_ref, o_ref):
    o_ref[...] = (jnp.dot(x_ref[...], w_ref[...],
                          preferred_element_type=jnp.float32)
                  + b_ref[...]).astype(o_ref.dtype)


def input_projection(x2d, w_all, b_all):
    M, E = x2d.shape
    G = w_all.shape[1]
    return pl.pallas_call(
        _input_proj_kernel,
        out_shape=jax.ShapeDtypeStruct((M, G), jnp.float32),
        grid_spec=pltpu.PrefetchScalarGridSpec(
            num_scalar_prefetch=0,
            grid=(1,),
            in_specs=[
                pl.BlockSpec((M, E), lambda i: (0, 0)),
                pl.BlockSpec((E, G), lambda i: (0, 0)),
                pl.BlockSpec((1, G), lambda i: (0, 0)),
            ],
            out_specs=pl.BlockSpec((M, G), lambda i: (0, 0)),
        ),
        compiler_params=pltpu.CompilerParams(
            dimension_semantics=("arbitrary",)),
    )(x2d, w_all, b_all)


# ----------------------------------------------------------------------------
# Kernel 2: bidirectional LSTM recurrence + fused classifier epilogue.
# Grid = (2,) over directions, "parallel" (independent -> 2 TCs on v7x).
# Time loop is an in-kernel fori_loop; h/c live in vregs as loop carries.
# Per direction d:
#   xp_ref  : (T, B, 4H)  precomputed x-projection (+bias) for this direction
#   whh_ref : (1, H, 4H)  W_hh^T for this direction
#   wout_ref: (1, H, C)   classifier weight slice (transposed) for this direction
#   out_ref : (1, B, C)   partial logits  h_final_d @ W_d^T
# PyTorch gate order: i, f, g, o.
# ----------------------------------------------------------------------------
def _bilstm_head_kernel(xp_ref, whh_ref, wout_ref, out_ref):
    d = pl.program_id(0)
    T, B, _ = xp_ref.shape
    H = whh_ref.shape[1]

    whh = whh_ref[0]            # (H, 4H), loop-invariant -> stays resident
    cdt = whh.dtype             # matmul input dtype (f32 here; bf16 for v6e/v7x)

    def step(s, carry):
        h, c = carry
        # forward walks t = 0..T-1, backward walks t = T-1..0 (no jnp.flip).
        t = jnp.where(d == 0, s, T - 1 - s)
        gates = xp_ref[t] + jnp.dot(h.astype(cdt), whh,
                                    preferred_element_type=jnp.float32)
        # NOTE: with H a multiple of 128 these lane slices are tile-aligned;
        # at the demo H=32 they cost a small in-vreg relayout only.
        i_g = jax.nn.sigmoid(gates[:, 0 * H:1 * H])
        f_g = jax.nn.sigmoid(gates[:, 1 * H:2 * H])
        g_g = jnp.tanh(gates[:, 2 * H:3 * H])
        o_g = jax.nn.sigmoid(gates[:, 3 * H:4 * H])
        c_new = f_g * c + i_g * g_g
        h_new = o_g * jnp.tanh(c_new)
        return h_new, c_new

    h0 = jnp.zeros((B, H), jnp.float32)
    c0 = jnp.zeros((B, H), jnp.float32)
    h_T, _ = lax.fori_loop(0, T, step, (h0, c0))

    # Fused classifier contribution of this direction (bias added by wrapper).
    out_ref[0] = jnp.dot(h_T.astype(cdt), wout_ref[0],
                         preferred_element_type=jnp.float32).astype(out_ref.dtype)


def bilstm_head(x_proj_tm, whh_stack, wout_stack):
    """x_proj_tm: (T, B, 8H) f32; whh_stack: (2, H, 4H); wout_stack: (2, H, C)."""
    T, B, G8 = x_proj_tm.shape
    H = whh_stack.shape[1]
    C = wout_stack.shape[2]
    G4 = G8 // 2
    # TODO(synk): for long sequences the (T, B, 4H) block should be chunked in
    # time (extra grid axis) to respect the VMEM budget (64 MiB on v7x).
    return pl.pallas_call(
        _bilstm_head_kernel,
        out_shape=jax.ShapeDtypeStruct((2, B, C), jnp.float32),
        grid_spec=pltpu.PrefetchScalarGridSpec(
            num_scalar_prefetch=0,
            grid=(2,),
            in_specs=[
                pl.BlockSpec((T, B, G4), lambda d: (0, 0, d)),   # per-direction lane block
                pl.BlockSpec((1, H, G4), lambda d: (d, 0, 0)),
                pl.BlockSpec((1, H, C), lambda d: (d, 0, 0)),
            ],
            out_specs=pl.BlockSpec((1, B, C), lambda d: (d, 0, 0)),
        ),
        compiler_params=pltpu.CompilerParams(
            dimension_semantics=("parallel",)),   # fwd/bwd independent
    )(x_proj_tm, whh_stack, wout_stack)


# ----------------------------------------------------------------------------
# Full model forward
# ----------------------------------------------------------------------------
def lstm_model_forward(params, token_ids, compute_dtype=jnp.float32):
    """token_ids: (B, T) int32. Returns logits (B, 43).

    compute_dtype=jnp.bfloat16 feeds bf16 operands to the MXU (f32 accumulate)
    on v6e/v7x; f32 is used here to match the f32 reference bit-closely.
    """
    assert len(params["lstm_layers"]) == 1, (
        "forward() is only shape-consistent with the classifier for num_layers == 1")
    layer = params["lstm_layers"][0]
    B, T = token_ids.shape
    H = layer["w_hh_f"].shape[1]

    # Embedding gather directly in time-major order (transpose the tiny int32
    # id matrix instead of the (B,T,E) activation tensor).
    emb_tm = jnp.take(params["embedding"], token_ids.T, axis=0)      # (T, B, E)
    E = emb_tm.shape[-1]
    x2d = emb_tm.reshape(T * B, E).astype(compute_dtype)             # free reshape

    # One large matmul for both directions, biases folded in.
    w_all = jnp.concatenate([layer["w_ih_f"].T, layer["w_ih_b"].T],
                            axis=1).astype(compute_dtype)            # (E, 8H)
    b_all = jnp.concatenate([layer["b_ih_f"] + layer["b_hh_f"],
                             layer["b_ih_b"] + layer["b_hh_b"]]).reshape(1, 8 * H)
    x_proj = input_projection(x2d, w_all, b_all)                     # (T*B, 8H) f32
    x_proj_tm = x_proj.reshape(T, B, 2 * 4 * H)                      # free reshape

    whh_stack = jnp.stack([layer["w_hh_f"].T,
                           layer["w_hh_b"].T]).astype(compute_dtype)  # (2, H, 4H)

    # Classifier fused into the recurrence epilogue: split W (C, 2H) per direction.
    w_lin = params["linear_w"]                                       # (C, 2H)
    wout_stack = jnp.stack([w_lin[:, :H].T,
                            w_lin[:, H:].T]).astype(compute_dtype)   # (2, H, C)

    partial = bilstm_head(x_proj_tm, whh_stack, wout_stack)          # (2, B, C)
    # Tiny glue: sum the two directions' partial logits and add the bias.
    return partial[0] + partial[1] + params["linear_b"][None, :]


# ----------------------------------------------------------------------------
# Pure-JAX reference (for correctness check)
# ----------------------------------------------------------------------------
def _ref_lstm_dir(x_tbe, w_ih, w_hh, b_ih, b_hh):
    T, B, _ = x_tbe.shape
    H = w_hh.shape[1]

    def step(carry, x_t):
        h, c = carry
        g = x_t @ w_ih.T + b_ih + h @ w_hh.T + b_hh
        i = jax.nn.sigmoid(g[:, 0 * H:1 * H])
        f = jax.nn.sigmoid(g[:, 1 * H:2 * H])
        gg = jnp.tanh(g[:, 2 * H:3 * H])
        o = jax.nn.sigmoid(g[:, 3 * H:4 * H])
        c = f * c + i * gg
        h = o * jnp.tanh(c)
        return (h, c), h

    (h_T, _), out = lax.scan(step, (jnp.zeros((B, H)), jnp.zeros((B, H))), x_tbe)
    return out, h_T


def ref_forward(params, token_ids):
    emb = jnp.take(params["embedding"], token_ids, axis=0)
    x = jnp.transpose(emb, (1, 0, 2))
    layer = params["lstm_layers"][0]
    _, h_f = _ref_lstm_dir(x, layer["w_ih_f"], layer["w_hh_f"],
                           layer["b_ih_f"], layer["b_hh_f"])
    _, h_b = _ref_lstm_dir(jnp.flip(x, 0), layer["w_ih_b"], layer["w_hh_b"],
                           layer["b_ih_b"], layer["b_hh_b"])
    hc = jnp.concatenate([h_f, h_b], axis=1)
    return hc @ params["linear_w"].T + params["linear_b"]


# ----------------------------------------------------------------------------
# Deterministic parameter init
# ----------------------------------------------------------------------------
def init_params(key, vocab_size, embedding_dim, hidden_dim, num_layers, num_classes=43):
    keys = jax.random.split(key, 3 + num_layers)
    scale = 1.0 / np.sqrt(hidden_dim)

    params = {}
    params["embedding"] = jax.random.normal(
        keys[0], (vocab_size, embedding_dim), jnp.float32)

    layers = []
    for l in range(num_layers):
        in_dim = embedding_dim if l == 0 else 2 * hidden_dim
        lk = jax.random.split(keys[3 + l], 8)
        u = lambda k, shape: jax.random.uniform(
            k, shape, jnp.float32, minval=-scale, maxval=scale)
        layers.append(dict(
            w_ih_f=u(lk[0], (4 * hidden_dim, in_dim)),
            w_hh_f=u(lk[1], (4 * hidden_dim, hidden_dim)),
            b_ih_f=u(lk[2], (4 * hidden_dim,)),
            b_hh_f=u(lk[3], (4 * hidden_dim,)),
            w_ih_b=u(lk[4], (4 * hidden_dim, in_dim)),
            w_hh_b=u(lk[5], (4 * hidden_dim, hidden_dim)),
            b_ih_b=u(lk[6], (4 * hidden_dim,)),
            b_hh_b=u(lk[7], (4 * hidden_dim,)),
        ))
    params["lstm_layers"] = layers

    fan_in = 2 * hidden_dim * num_layers
    lscale = 1.0 / np.sqrt(fan_in)
    params["linear_w"] = jax.random.uniform(
        keys[1], (num_classes, fan_in), jnp.float32, minval=-lscale, maxval=lscale)
    params["linear_b"] = jax.random.uniform(
        keys[2], (num_classes,), jnp.float32, minval=-lscale, maxval=lscale)
    return params


if __name__ == "__main__":
    # Small, forward-consistent shapes.
    vocab_size = 50
    embedding_dim = 32
    hidden_dim = 32
    num_layers = 1      # forward() only type-checks for num_layers == 1
    batch = 2
    seq_len = 8

    key = jax.random.PRNGKey(0)
    pkey, dkey = jax.random.split(key)
    params = init_params(pkey, vocab_size, embedding_dim, hidden_dim, num_layers)

    token_ids = jax.random.randint(dkey, (batch, seq_len), 0, vocab_size, jnp.int32)

    fwd = jax.jit(functools.partial(lstm_model_forward, params))
    logits = fwd(token_ids)
    jax.block_until_ready(logits)

    ref = ref_forward(params, token_ids)
    np.testing.assert_allclose(np.asarray(logits), np.asarray(ref),
                               rtol=1e-4, atol=1e-4)
    assert logits.shape == (batch, 43)
    print("KERNEL_OK")
</pallas_src>

<mosaic_0001>
module attributes {stable_mosaic.version = 11 : i64} {
  func.func @_input_proj_kernel(%arg0: i32, %arg1: memref<16x32xf32, #tpu.memory_space<vmem>>, %arg2: memref<32x256xf32, #tpu.memory_space<vmem>>, %arg3: memref<1x256xf32, #tpu.memory_space<vmem>>, %arg4: memref<16x256xf32, #tpu.memory_space<vmem>>) attributes {dimension_semantics = [#tpu.dimension_semantics<arbitrary>], iteration_bounds = array<i64: 1>, scalar_prefetch = 0 : i64, scratch_operands = 0 : i64, tpu.core_type = #tpu.core_type<tc>, window_params = [{pipeline_mode = #tpu.pipeline_mode<synchronous>, transform_indices = @transform_0, window_bounds = array<i64: 16, 32>}, {pipeline_mode = #tpu.pipeline_mode<synchronous>, transform_indices = @transform_1, window_bounds = array<i64: 32, 256>}, {pipeline_mode = #tpu.pipeline_mode<synchronous>, transform_indices = @transform_2, window_bounds = array<i64: 1, 256>}, {pipeline_mode = #tpu.pipeline_mode<synchronous>, transform_indices = @transform_3, window_bounds = array<i64: 16, 256>}]} {
    %c0 = arith.constant 0 : index
    %c0_0 = arith.constant 0 : index
    %0 = vector.load %arg1[%c0, %c0_0] : memref<16x32xf32, #tpu.memory_space<vmem>>, vector<16x32xf32>
    %c0_1 = arith.constant 0 : index
    %c0_2 = arith.constant 0 : index
    %1 = vector.load %arg2[%c0_1, %c0_2] : memref<32x256xf32, #tpu.memory_space<vmem>>, vector<32x256xf32>
    %cst = arith.constant dense<0.000000e+00> : vector<16x256xf32>
    %2 = tpu.matmul %0, %1, %cst {dimension_numbers = #tpu.dot_dimension_numbers<[1], [0], [0], [1], [0, 0, 1, 1], [], []>} : vector<16x32xf32>, vector<32x256xf32>, vector<16x256xf32> -> vector<16x256xf32>
    %c0_3 = arith.constant 0 : index
    %c0_4 = arith.constant 0 : index
    %3 = vector.load %arg3[%c0_3, %c0_4] : memref<1x256xf32, #tpu.memory_space<vmem>>, vector<1x256xf32>
    %4 = vector.broadcast %3 : vector<1x256xf32> to vector<16x256xf32>
    %5 = arith.addf %2, %4 : vector<16x256xf32>
    %c0_5 = arith.constant 0 : index
    %c0_6 = arith.constant 0 : index
    %6 = vector.load %arg4[%c0_5, %c0_6] : memref<16x256xf32, #tpu.memory_space<vmem>>, vector<16x256xf32>
    tpu.vector_store %arg4[%c0_5, %c0_6], %5 {strides = array<i32>} : memref<16x256xf32, #tpu.memory_space<vmem>>, vector<16x256xf32>,
    return
  }
  func.func @transform_0(%arg0: i32) -> (i32, i32) {
    %c0_i32 = arith.constant 0 : i32
    %c0_i32_0 = arith.constant 0 : i32
    %c0_i32_1 = arith.constant 0 : i32
    return %c0_i32, %c0_i32_0 : i32, i32
  }
  func.func @transform_1(%arg0: i32) -> (i32, i32) {
    %c0_i32 = arith.constant 0 : i32
    %c0_i32_0 = arith.constant 0 : i32
    %c0_i32_1 = arith.constant 0 : i32
    return %c0_i32, %c0_i32_0 : i32, i32
  }
  func.func @transform_2(%arg0: i32) -> (i32, i32) {
    %c0_i32 = arith.constant 0 : i32
    %c0_i32_0 = arith.constant 0 : i32
    %c0_i32_1 = arith.constant 0 : i32
    return %c0_i32, %c0_i32_0 : i32, i32
  }
  func.func @transform_3(%arg0: i32) -> (i32, i32) {
    %c0_i32 = arith.constant 0 : i32
    %c0_i32_0 = arith.constant 0 : i32
    %c0_i32_1 = arith.constant 0 : i32
    return %c0_i32, %c0_i32_0 : i32, i32
  }
}

module attributes {stable_mosaic.version = 11 : i64} {
  func.func @_bilstm_head_kernel(%arg0: i32, %arg1: memref<8x2x128xf32, #tpu.memory_space<vmem>>, %arg2: memref<1x32x128xf32, #tpu.memory_space<vmem>>, %arg3: memref<1x32x43xf32, #tpu.memory_space<vmem>>, %arg4: memref<1x2x43xf32, #tpu.memory_space<vmem>>) attributes {dimension_semantics = [#tpu.dimension_semantics<parallel>], iteration_bounds = array<i64: 2>, scalar_prefetch = 0 : i64, scratch_operands = 0 : i64, tpu.core_type = #tpu.core_type<tc>, window_params = [{transform_indices = @transform_0, window_bounds = array<i64: 8, 2, 128>}, {transform_indices = @transform_1, window_bounds = array<i64: 1, 32, 128>}, {transform_indices = @transform_2, window_bounds = array<i64: 1, 32, 43>}, {transform_indices = @transform_3, window_bounds = array<i64: 1, 2, 43>}]} {
    %c0 = arith.constant 0 : index
    %c0_0 = arith.constant 0 : index
    %c0_1 = arith.constant 0 : index
    %0 = vector.load %arg2[%c0, %c0_0, %c0_1] : memref<1x32x128xf32, #tpu.memory_space<vmem>>, vector<1x32x128xf32>
    %1 = vector.shape_cast %0 : vector<1x32x128xf32> to vector<32x128xf32>
    %cst = arith.constant 0.000000e+00 : f32
    %2 = vector.broadcast %cst : f32 to vector<2x32xf32>
    %cst_2 = arith.constant 0.000000e+00 : f32
    %3 = vector.broadcast %cst_2 : f32 to vector<2x32xf32>
    %c0_i32 = arith.constant 0 : i32
    %c8_i32 = arith.constant 8 : i32
    %4 = arith.addi %c0_i32, %c8_i32 : i32
    %c1_i32 = arith.constant 1 : i32
    %5:2 = scf.for %arg5 = %c0_i32 to %4 step %c1_i32 iter_args(%arg6 = %2, %arg7 = %3) -> (vector<2x32xf32>, vector<2x32xf32>)  : i32 {
      %c0_i32_11 = arith.constant 0 : i32
      %12 = arith.cmpi eq, %arg0, %c0_i32_11 : i32
      %c7_i32 = arith.constant 7 : i32
      %13 = arith.subi %c7_i32, %arg5 : i32
      %14 = arith.select %12, %arg5, %13 : i32
      %15 = arith.index_cast %14 : i32 to index
      %c0_12 = arith.constant 0 : index
      %c0_13 = arith.constant 0 : index
      %16 = vector.load %arg1[%15, %c0_12, %c0_13] : memref<8x2x128xf32, #tpu.memory_space<vmem>>, vector<1x2x128xf32>
      %17 = vector.shape_cast %16 : vector<1x2x128xf32> to vector<2x128xf32>
      %cst_14 = arith.constant dense<0.000000e+00> : vector<2x128xf32>
      %18 = tpu.matmul %arg6, %1, %cst_14 {dimension_numbers = #tpu.dot_dimension_numbers<[1], [0], [0], [1], [0, 0, 1, 1], [], []>} : vector<2x32xf32>, vector<32x128xf32>, vector<2x128xf32> -> vector<2x128xf32>
      %19 = arith.addf %17, %18 : vector<2x128xf32>
      %20 = vector.extract_strided_slice %19 {offsets = [0, 0], sizes = [2, 32], strides = [1, 1]} : vector<2x128xf32> to vector<2x32xf32>
      %21 = arith.negf %20 : vector<2x32xf32>
      %22 = math.exp %21 : vector<2x32xf32>
      %cst_15 = arith.constant 1.000000e+00 : f32
      %23 = vector.broadcast %cst_15 : f32 to vector<2x32xf32>
      %24 = arith.addf %23, %22 : vector<2x32xf32>
      %25 = arith.divf %23, %24 : vector<2x32xf32>
      %26 = vector.extract_strided_slice %19 {offsets = [0, 32], sizes = [2, 32], strides = [1, 1]} : vector<2x128xf32> to vector<2x32xf32>
      %27 = arith.negf %26 : vector<2x32xf32>
      %28 = math.exp %27 : vector<2x32xf32>
      %cst_16 = arith.constant 1.000000e+00 : f32
      %29 = vector.broadcast %cst_16 : f32 to vector<2x32xf32>
      %30 = arith.addf %29, %28 : vector<2x32xf32>
      %31 = arith.divf %29, %30 : vector<2x32xf32>
      %32 = vector.extract_strided_slice %19 {offsets = [0, 64], sizes = [2, 32], strides = [1, 1]} : vector<2x128xf32> to vector<2x32xf32>
      %33 = math.tanh %32 : vector<2x32xf32>
      %34 = vector.extract_strided_slice %19 {offsets = [0, 96], sizes = [2, 32], strides = [1, 1]} : vector<2x128xf32> to vector<2x32xf32>
      %35 = arith.negf %34 : vector<2x32xf32>
      %36 = math.exp %35 : vector<2x32xf32>
      %cst_17 = arith.constant 1.000000e+00 : f32
      %37 = vector.broadcast %cst_17 : f32 to vector<2x32xf32>
      %38 = arith.addf %37, %36 : vector<2x32xf32>
      %39 = arith.divf %37, %38 : vector<2x32xf32>
      %40 = arith.mulf %31, %arg7 : vector<2x32xf32>
      %41 = arith.mulf %25, %33 : vector<2x32xf32>
      %42 = arith.addf %40, %41 : vector<2x32xf32>
      %43 = math.tanh %42 : vector<2x32xf32>
      %44 = arith.mulf %39, %43 : vector<2x32xf32>
      scf.yield %44, %42 : vector<2x32xf32>, vector<2x32xf32>
    }
    %c8_i32_3 = arith.constant 8 : i32
    %c0_4 = arith.constant 0 : index
    %c0_5 = arith.constant 0 : index
    %c0_6 = arith.constant 0 : index
    %6 = vector.load %arg3[%c0_4, %c0_5, %c0_6] : memref<1x32x43xf32, #tpu.memory_space<vmem>>, vector<1x32x43xf32>
    %7 = vector.shape_cast %6 : vector<1x32x43xf32> to vector<32x43xf32>
    %cst_7 = arith.constant dense<0.000000e+00> : vector<2x43xf32>
    %8 = tpu.matmul %5#0, %7, %cst_7 {dimension_numbers = #tpu.dot_dimension_numbers<[1], [0], [0], [1], [0, 0, 1, 1], [], []>} : vector<2x32xf32>, vector<32x43xf32>, vector<2x43xf32> -> vector<2x43xf32>
    %c0_8 = arith.constant 0 : index
    %c0_9 = arith.constant 0 : index
    %c0_10 = arith.constant 0 : index
    %9 = vector.load %arg4[%c0_8, %c0_9, %c0_10] : memref<1x2x43xf32, #tpu.memory_space<vmem>>, vector<1x2x43xf32>
    %10 = vector.shape_cast %9 : vector<1x2x43xf32> to vector<2x43xf32>
    %11 = vector.shape_cast %8 : vector<2x43xf32> to vector<1x2x43xf32>
    tpu.vector_store %arg4[%c0_8, %c0_9, %c0_10], %11 {strides = array<i32>} : memref<1x2x43xf32, #tpu.memory_space<vmem>>, vector<1x2x43xf32>,
    return
  }
  func.func @transform_0(%arg0: i32) -> (i32, i32, i32) {
    %c0_i32 = arith.constant 0 : i32
    %c0_i32_0 = arith.constant 0 : i32
    %c0_i32_1 = arith.constant 0 : i32
    return %c0_i32, %c0_i32_0, %arg0 : i32, i32, i32
  }
  func.func @transform_1(%arg0: i32) -> (i32, i32, i32) {
    %c0_i32 = arith.constant 0 : i32
    %c0_i32_0 = arith.constant 0 : i32
    %c0_i32_1 = arith.constant 0 : i32
    return %arg0, %c0_i32, %c0_i32_0 : i32, i32, i32
  }
  func.func @transform_2(%arg0: i32) -> (i32, i32, i32) {
    %c0_i32 = arith.constant 0 : i32
    %c0_i32_0 = arith.constant 0 : i32
    %c0_i32_1 = arith.constant 0 : i32
    return %arg0, %c0_i32, %c0_i32_0 : i32, i32, i32
  }
  func.func @transform_3(%arg0: i32) -> (i32, i32, i32) {
    %c0_i32 = arith.constant 0 : i32
    %c0_i32_0 = arith.constant 0 : i32
    %c0_i32_1 = arith.constant 0 : i32
    return %arg0, %c0_i32, %c0_i32_0 : i32, i32, i32
  }
}

</mosaic_0001>

<bundles_post_ra>
// kernel: lstm_model_forward.2
= control target key start
LH: loop header
LB: loop body
LE: loop exit
PB: predicated region body
PF: predicated region fallthrough
CT: control target
= control target key end

     0   :  { %v143_v3 = vmov 0.0   ;;  %vm36_vm0 = vcmask 261120   ;;  %v26_v15 = vlaneseq  ;;  %s209_s1 = inlined_call_operand.vmem [shape: f32[32,256], index: 1, kind: input, shape index: {}]   ;;  %s210_s0 = inlined_call_operand.vmem [shape: f32[16,32], index: 0, kind: input, shape index: {}]   ;;  %s211_s2 = inlined_call_operand.vmem [shape: f32[1,256], index: 2, kind: input, shape index: {}]   ;;  %s212_s3 = inlined_call_operand.vmem [shape: f32[16,256], index: 3, kind: output, shape index: {}]  }
   0x1   :  { %v17_v0 = vld [vmem:[%s209_s1 + $0x8] sm:$0xff]  ;;  %v19_v1 = vld [vmem:[%s209_s1 + $0x18] sm:$0xff]  ;;  %v16_v2 = vld [vmem:[%s209_s1] sm:$0xff]  ;;  %107 = vmatprep.mubr.f32.mxu0 %v143_v3  ;;  %113 = vmatprep.mubr.f32.mxu1 %v143_v3 }
   0x2   :  { %v130_v4 = vpack.c.bf16 %v19_v1, %v17_v0  ;;  %v18_v5 = vld [vmem:[%s209_s1 + $0x10] sm:$0xff]  ;;  %v21_v6 = vld [vmem:[%s209_s1 + $0x28] sm:$0xff]  ;;  %v23_v7 = vld [vmem:[%s209_s1 + $0x38] sm:$0xff]  ;;  %v27_v16 = vshrl.u32 %v26_v15, 7 }
   0x3   :  { %v132_v8 = vpack.c.bf16 %v18_v5, %v16_v2  ;;  %v134_v9 = vpack.c.bf16 %v23_v7, %v21_v6  ;;  %v20_v10 = vld [vmem:[%s209_s1 + $0x20] sm:$0xff]  ;;  %v22_v11 = vld [vmem:[%s209_s1 + $0x30] sm:$0xff]  ;;  %v15_v14 = vld [vmem:[%s210_s0 + $0x8] sm:$0xff] }
   0x4   :  { %131 = vmatprep.subr.bf16.mxu0 %v130_v4  ;;  %138 = vmatprep.subr.bf16.mxu1 %v130_v4  ;;  %v136_v12 = vpack.c.bf16 %v22_v11, %v20_v10  ;;  %v14_v13 = vld [vmem:[%s210_s0] sm:$0xff]  ;;  %v28_v17 = vsub.s32 0, %v27_v16  ;;  %v32_v19 = vsub.s32 1, %v27_v16 }
   0x5   :  { %133 = vmatpush1.bf16.msra.mxu0 %v132_v8  ;;  %140 = vmatpush1.bf16.msra.mxu1 %v132_v8  ;;  %v24_v18 = vld [vmem:[%s211_s2] sm:$0x3] }
   0x6   :  { %135 = vmatprep.subr.bf16.mxu0 %v134_v9  ;;  %139 = vmatprep.subr.bf16.mxu1 %v134_v9  ;;  %v29_v20 = vrot.slane %v24_v18, %v28_v17  ;;  %v33_v21 = vrot.slane %v24_v18, %v32_v19 }
   0x9   :  { %137 = vmatpush1.bf16.msra.mxu0 %v136_v12  ;;  %141 = vmatpush1.bf16.msra.mxu1 %v136_v12 }
   0xc   :  { %128 = vmatmul.mubr.msk.f32.vlgmr.msra.gmra.mrb[0].mxu0 %vm36_vm0, %v14_v13  ;;  %129 = vmatmul.mubr.msk.f32.vlgmr.msra.gmra.mrb[0].mxu1 %vm36_vm0, %v15_v14 }
  0xdf   :  { %v109_v22 = vpop.f32.mrb[0].mxu0  ;;  %v115_v23 = vpop.f32.mrb[0].mxu1 }
  0xe0   :  { %v110_v24 = vadd.f32 %v109_v22, %v29_v20  ;;  %v116_v25 = vadd.f32 %v115_v23, %v29_v20  ;;  %v111_v26 = vpop.f32.mrb[1].mxu0  ;;  %v117_v27 = vpop.f32.mrb[1].mxu1 }
  0xe1   :  { %v112_v28 = vadd.f32 %v111_v26, %v33_v21  ;;  %v118_v29 = vadd.f32 %v117_v27, %v33_v21 }
  0xe2   :  { %120 = vst [vmem:[%s212_s3] sm:$0xff] %v110_v24  ;;  %122 = vst [vmem:[%s212_s3 + $0x10] sm:$0xff] %v116_v25 }
  0xe3   :  { %121 = vst [vmem:[%s212_s3 + $0x8] sm:$0xff] %v112_v28  ;;  %123 = vst [vmem:[%s212_s3 + $0x18] sm:$0xff] %v118_v29 }

// kernel: lstm_model_forward.3
= control target key start
LH: loop header
LB: loop body
LE: loop exit
PB: predicated region body
PF: predicated region fallthrough
CT: control target
= control target key end

     0   :  { %s782_s12 = smov 0   ;;  %s784_s13 = smov 0   ;;  %s874_s0 = inlined_call_operand.vmem [shape: f32[8,2,256], index: 0, kind: input, shape index: {}]   ;;  %s875_s1 = inlined_call_operand.vmem [shape: f32[2,32,128], index: 1, kind: input, shape index: {}]   ;;  %s876_s2 = inlined_call_operand.vmem [shape: f32[2,32,43], index: 2, kind: input, shape index: {}]   ;;  %s877_s3 = inlined_call_operand.vmem [shape: f32[2,2,43], index: 3, kind: output, shape index: {}]  }
   0x1   :  { %s786_s14 = smov 0  }
   0x2 LB: > { %s798_s15 = sadd.s32 4294967295, %s739_s14   ;;  %s801_s16 = sadd.s32 1, %s739_s14   ;;  %s739_s14 = sphi %s786_s14, %s880_s14   ;;  %s735_s13 = sphi %s784_s13, %s879_s13   ;;  %s731_s12 = sphi %s782_s12, %s878_s12  }
   0x3   : > { %s17_s17 = ssub.s32 %s739_s14, %s801_s16  ;;  %s20_s18 = sadd.s32 1, %s735_s13 }
   0x4   : > { %p18_p0 = scmp.eq.s32.totalorder %s17_s17, 0  ;;  %p27_p1 = scmp.ne.s32.totalorder %s735_s13, %s731_s12 }
   0x5   : > { %p28_p2 = scmp.eq.s32.totalorder %s739_s14, 0  ;;  %p578_p4 = scmp.ge.s32.totalorder %s739_s14, 2 }
   0x6   : > { %s810_s19 = scalar_select %p18_p0, %s735_s13, %s20_s18  }
   0x7   : > { %p29_p3 = por %p28_p2, %p27_p1  ;;  %131 = sbr.rel (%p578_p4) target bundleno = 23 (0x17), region = 16 }
   0xe   : > { %134 = sbr.rel (!%p29_p3) target bundleno = 23 (0x17), region = 20  ;;  %s136_s20 = sand.u32 (%p29_p3), 1, %s735_s13  }
   0xf   : > { %s580_s21 = sshll.u32 (%p29_p3), %s739_s14, 1  ;;  %s579_s22 = sshll.u32 (%p29_p3), %s136_s20, 4 }
  0x10   : > { %s140_s25 = scalar_lea.vmem (%p29_p3), %s874_s0, %s580_s21  ;;  %s138_s26 = scalar_lea.vmem (%p29_p3), [#allocation2], %s579_s22 }
  0x11   : > { %v156_v0 = vld [vmem:[%s140_s25] sm:$0x3] (%p29_p3)  ;;  %v158_v1 = vld [vmem:[%s140_s25 + $0x4] sm:$0x3] (%p29_p3)  ;;  %v160_v2 = vld [vmem:[%s140_s25 + $0x8] sm:$0x3] (%p29_p3) }
  0x12   : > { %157 = vst [vmem:[%s138_s26] sm:$0x3] (%p29_p3), %v156_v0  ;;  %159 = vst [vmem:[%s138_s26 + $0x2] sm:$0x3] (%p29_p3), %v158_v1  ;;  %v162_v3 = vld [vmem:[%s140_s25 + $0xc] sm:$0x3] (%p29_p3) }
  0x13   : > { %v164_v4 = vld [vmem:[%s140_s25 + $0x10] sm:$0x3] (%p29_p3)  ;;  %161 = vst [vmem:[%s138_s26 + $0x4] sm:$0x3] (%p29_p3), %v160_v2  ;;  %163 = vst [vmem:[%s138_s26 + $0x6] sm:$0x3] (%p29_p3), %v162_v3 }
  0x14   : > { %165 = vst [vmem:[%s138_s26 + $0x8] sm:$0x3] (%p29_p3), %v164_v4  ;;  %v166_v5 = vld [vmem:[%s140_s25 + $0x14] sm:$0x3] (%p29_p3)  ;;  %v168_v6 = vld [vmem:[%s140_s25 + $0x18] sm:$0x3] (%p29_p3) }
  0x15   : > { %v170_v7 = vld [vmem:[%s140_s25 + $0x1c] sm:$0x3]  ;;  %167 = vst [vmem:[%s138_s26 + $0xa] sm:$0x3] %v166_v5  ;;  %169 = vst [vmem:[%s138_s26 + $0xc] sm:$0x3] %v168_v6 }
  0x16   : > { %171 = vst [vmem:[%s138_s26 + $0xe] sm:$0x3] %v170_v7 }
  0x17 PF: > { %p581_p5 = scmp.ge.s32.totalorder %s739_s14, 1  ;;  %p225_p6 = scmp.lt.s32.totalorder %s739_s14, 3 }
  0x19   : > { %p226_p7 = pnand %p581_p5, %p225_p6 }
  0x1a   : > { %s232_s27 = sand.u32 (!%p226_p7), 1, %s731_s12   ;;  %p264_p8 = scmp.lt.s32.totalorder (!%p226_p7), %s798_s15, 1  ;;  %v741_v12 = vmov (!%p226_p7), 0.0   ;;  %v745_v13 = vmov (!%p226_p7), 0.0  }
  0x1b   : > { %229 = sbr.rel (%p226_p7) target bundleno = 1071 (0x42f), region = 69  ;;  %s822_s28 = sshll.u32 (!%p226_p7), %s232_s27, 4 }
  0x1c   : > { %s234_s17 = scalar_lea.vmem (!%p226_p7), [#allocation2], %s822_s28  ;;  %s841_s18 = smov (!%p226_p7), 0  }
  0x22   : > { %s265_s29 = scalar_select %p264_p8, %s798_s15, 1 }
  0x24   : > { %s594_s30 = sshll.u32 %s265_s29, 5  ;;  %s587_s4 = sshll.u32 %s265_s29, 1 }
  0x25   : > { %s268_s7 = scalar_lea.vmem %s875_s1, %s594_s30  ;;  %s831_s10 = scalar_lea.vmem %s876_s2, %s594_s30 }
  0x26   : > { %s836_s12 = scalar_lea.vmem %s877_s3, %s587_s4  ;;  %v838_v8 = vld [vmem:[%s268_s7] sm:$0xff]  ;;  %v279_v9 = vld [vmem:[%s268_s7 + $0x8] sm:$0xff]  ;;  %v280_v10 = vld [vmem:[%s268_s7 + $0x10] sm:$0xff] }
  0x27   : > { %v281_v11 = vld [vmem:[%s268_s7 + $0x18] sm:$0xff] }
  0x28 LB: >> { %v629_v14 = vpack.c.bf16 %v279_v9, %v838_v8  ;;  %v753_v15 = vmov 0.0|0.0   ;;  %s754_s20 = smov 32   ;;  %v632_v16 = vpack.c.bf16 %v281_v11, %v280_v10  ;;  %vm755_vm0 = vmmov 0   ;;  %p290_p9 = scmp.eq.s32.totalorder %s798_s15, 0  ;;  %s751_s18 = sphi %s841_s18, %s287_s18   ;;  %v747_v13 = vphi %v745_v13, %v746_v13   ;;  %v743_v12 = vphi %v741_v12, %v390_v12  }
  0x29   : >> { %628 = vmatprep.subr.bf16.mxu0 %v753_v15  ;;  %297 = vrot.lane.b32.xlu0 %v747_v13, %s754_s20  ;;  %v756_v17 = vmov 0.0   ;;  %vm299_vm1 = vcmask 261120   ;;  %s291_s21 = ssub.s32 7, %s751_s18  ;;  %s757_s25 = smov 64  }
  0x2a   : >> { %630 = vmatpush3.bf16.msra.mxu0 %v629_v14  ;;  %614 = vmatprep.mubr.msk.f32.mxu0 %vm755_vm0, %v756_v17  ;;  %s292_s22 = scalar_select %p290_p9, %s751_s18, %s291_s21 }
  0x2b   : >> { %631 = vmatprep.subr.bf16.mxu0 %v753_v15  ;;  %s287_s18 = sadd.s32 1, %s751_s18  }
  0x2c   : >> { %s588_s23 = sshll.u32 %s292_s22, 1  ;;  %p284_p10 = scmp.ge.s32.totalorder %s287_s18, 8  }
  0x2d   : >> { %s294_s24 = scalar_lea.vmem %s234_s17, %s588_s23 [#allocation2]  ;;  %v397_v35 = vld [vmem:[%s831_s10] sm:$0xff] (%p284_p10)  ;;  %v398_v36 = vld [vmem:[%s831_s10 + $0x8] sm:$0xff] (%p284_p10)  ;;  %v399_v37 = vld [vmem:[%s831_s10 + $0x10] sm:$0xff] (%p284_p10)  ;;  %s758_s26 = smov (%p284_p10), 32   ;;  %v759_v38 = vmov (%p284_p10), 0.0|0.0   ;;  %vm760_vm2 = vmmov (%p284_p10), 0  }
  0x2e   : >> { %633 = vmatpush3.bf16.msra.mxu0 %v632_v16  ;;  %v295_v19 = vld [vmem:[%s294_s24] sm:$0x3]  ;;  %v635_v39 = vpack.c.bf16 (%p284_p10), %v398_v36, %v397_v35  ;;  %v400_v40 = vld [vmem:[%s831_s10 + $0x18] sm:$0xff] (%p284_p10)  ;;  %v761_v41 = vmov (%p284_p10), 0.0   ;;  %vm477_vm3 = vcmask (%p284_p10), 345088  }
  0x2f   : > { %634 = vmatprep.subr.bf16.mxu0 (%p284_p10), %v759_v38  ;;  %v638_v42 = vpack.c.bf16 (%p284_p10), %v400_v40, %v399_v37 }
  0x9b   : >> { %v298_v18 = vpop.permute.xlu0 %297 }
  0x9c   : >> { %615 = vmatmul.mubr.msk.f32.vlgmr.msra.gmra.mrb[0].mxu0 %vm299_vm1, %v298_v18 }
  0x9d   : > { %625 = vmatprep.mubr.msk.f32.mxu0 (%p284_p10), %vm760_vm2, %v761_v41  ;;  %636 = vmatpush3.bf16.msra.mxu0 (%p284_p10), %v635_v39 }
  0x9e   : > { %637 = vmatprep.subr.bf16.mxu0 (%p284_p10), %v759_v38 }
  0xa1   : > { %639 = vmatpush3.bf16.msra.mxu0 (%p284_p10), %v638_v42 }
 0x16f   : >> { %v368_v20 = vpop.f32.mrb[0].mxu0 }
 0x170   : >> { %v372_v21 = vadd.f32 %v368_v20, %v295_v19  ;;  %v616_v22 = vpop.f32.mrb[1].mxu0 }
 0x172   : >> { %697 = vtanh.f32 %v372_v21  ;;  %v590_v24 = vmul.f32 -1.442695, %v372_v21 }
 0x174   : >> { %699 = vpow2.f32 %v590_v24 }
 0x17c   : >> { %v698_v23 = vpop.eup %697 }
 0x17d   : >> { %382 = vrot.lane.b32.xlu0 %v698_v23, %s757_s25 }
 0x17e   : >> { %v700_v25 = vpop.eup %699 }
 0x17f   : >> { %v376_v26 = vadd.f32 1.0, %v700_v25 }
 0x181   : >> { %701 = vrcp.f32 %v376_v26 }
 0x18b   : >> { %v702_v27 = vpop.eup %701 }
 0x18c   : >> { %v380_v30 = vmul.f32 %v743_v12, %v702_v27 }
 0x1ef   : >> { %v383_v28 = vpop.permute.xlu0 %382 }
 0x1f0   : >> { %v385_v29 = vmul.f32 %v702_v27, %v383_v28 }
 0x1f2   : >> { %387 = vrot.lane.b32.xlu1 %v385_v29, %s754_s20 }
 0x264   : >> { %v388_v31 = vpop.permute.xlu1 %387 }
 0x265   : >> { %v390_v12 = vadd.f32 %v388_v31, %v380_v30  }
 0x267   : >> { %703 = vtanh.f32 %v390_v12 }
 0x271   : >> { %v704_v32 = vpop.eup %703 }
 0x272   : >> { %393 = vrot.lane.b32.xlu1 %v704_v32, %s757_s25 }
 0x2e1   : > { %286 = sbr.rel (!%p284_p10) target bundleno = 40 (0x28), region = 122 }
 0x2e4   : >> { %v394_v33 = vpop.permute.xlu1 %393 }
 0x2e5   : >> { %v396_v34 = vmul.f32 %v702_v27, %v394_v33  }
 0x2e7   : >> { %v746_v13 = vmov %v396_v34   ;;  %402 = vrot.lane.b32.xlu0 (%p284_p10), %v396_v34, %s758_s26 }
 0x359   : > { %v403_v43 = vpop.permute.xlu0 %402 }
 0x35a   : > { %626 = vmatmul.mubr.msk.f32.vlgmr.msra.gmra.mrb[0].mxu0 %vm299_vm1, %v403_v43 }
 0x42d   : > { %v473_v44 = vpop.f32.mrb[0].mxu0 }
 0x42e   : > { %478 = vst.msk [vmem:[%s836_s12] sm:$0x3] %vm477_vm3, %v473_v44  ;;  %v627_v45 = vpop.f32.mrb[1].mxu0 }
 0x42f PF: > { %p10_p11 = scmp.ge.s32.totalorder %s801_s16, 4   ;;  %s878_s12 = smov %s735_s13 }
 0x430   : > { %s879_s13 = smov %s810_s19  ;;  %s880_s14 = smov %s801_s16 }
 0x431   :  { %12 = sbr.rel (!%p10_p11) target bundleno = 2 (0x2), region = 133 }

</bundles_post_ra>
